<compile_context>
chip_gen: v7x
topology: tpu7x:2x2x1
jax: 0.10.0
libtpu: 0.0.40
codegen_flags: <defaults>
</compile_context>

<pallas_src>
import functools

import jax
import jax.numpy as jnp
from jax import lax
from jax.experimental import pallas as pl
from jax.experimental.pallas import tpu as pltpu

LANES = 128     # lane width
TR_MAX = 4096   # rows per grid step (multiple of 32 -> sublane-aligned for all dtypes)
NCORES = 2      # leading "parallel" axis (v7x megacore; harmless on v5e/v6e)


def _dice_bce_kernel(x_ref, t_ref, oi_ref, opt_ref, ob_ref,
                     *, bpc, tr, n, b_tail, total_blocks):
    c = pl.program_id(0)          # core / parallel axis
    i = pl.program_id(1)          # streaming / reduction axis
    b = c * bpc + i               # global row-block index (may overflow real count)

    @pl.when(i == 0)
    def _():
        oi_ref[...] = jnp.zeros_like(oi_ref)
        opt_ref[...] = jnp.zeros_like(opt_ref)
        ob_ref[...] = jnp.zeros_like(ob_ref)

    x = x_ref[...].astype(jnp.float32)
    t = t_ref[...].astype(jnp.float32)

    # sigmoid + logits-form BCE from one exp, one log, one approx reciprocal:
    #   p   = sigmoid(x)
    #   bce = softplus(x) - t*x == -(t*log(p) + (1-t)*log(1-p))
    # Matches torch.nn.functional.binary_cross_entropy(sigmoid(x), t) exactly
    # for |x| <= 100 (torch's -100 log clamp only differs beyond that).
    e = jnp.exp(-jnp.abs(x))
    d = 1.0 + e
    lp1 = jnp.log(d)                        # softplus(-|x|)
    r = pl.reciprocal(d, approx=True)       # EUP slot (has slack)
    inv = r * (2.0 - d * r)                 # one Newton step -> ~f32 exact
    p = jnp.where(x < 0.0, e * inv, inv)    # sigmoid(x)
    bce = jnp.maximum(x, 0.0) + lp1 - t * x
    prod = p * t
    pt = p + t                              # dice only needs sum(p) + sum(t)

    def accumulate(prod, pt, bce):
        # Pre-reduce the tile to one (8, 128) vreg per quantity (pure VPU adds),
        # then a single vreg read-modify-write on the resident output block.
        sh = (tr // 8, 8, LANES)
        oi_ref[0] += jnp.sum(prod.reshape(sh), axis=0)
        opt_ref[0] += jnp.sum(pt.reshape(sh), axis=0)
        ob_ref[0] += jnp.sum(bce.reshape(sh), axis=0)

    def accumulate_masked():
        # Only the trailing block(s) pay for this: drop padded / out-of-bounds
        # elements (global element index >= n) before accumulating.
        row = lax.broadcasted_iota(jnp.int32, (tr, LANES), 0)
        g_row = b * tr + row
        full_rows = n // LANES
        valid = g_row < full_rows
        rem = n % LANES
        if rem:
            lane = lax.broadcasted_iota(jnp.int32, (tr, LANES), 1)
            valid = valid | ((g_row == full_rows) & (lane < rem))
        accumulate(jnp.where(valid, prod, 0.0),
                   jnp.where(valid, pt, 0.0),
                   jnp.where(valid, bce, 0.0))

    if b_tail <= 0:
        accumulate_masked()                 # everything is in the tail (tiny inputs)
    elif b_tail >= total_blocks:
        accumulate(prod, pt, bce)           # perfectly aligned: no masking compiled in
    else:
        @pl.when(b < b_tail)
        def _():
            accumulate(prod, pt, bce)

        @pl.when(b >= b_tail)
        def _():
            accumulate_masked()


def dice_bce_loss(inputs, targets, smooth=1.0):
    n = int(inputs.size)
    x = inputs.reshape(-1)
    t = targets.reshape(-1)

    # Sublane multiple for the narrowest input dtype (8 f32, 16 bf16, 32 int8).
    itemsize = min(x.dtype.itemsize, t.dtype.itemsize, 4)
    sub = 8 * (4 // itemsize)

    rows = -(-max(n, 1) // LANES)
    rows = -(-rows // sub) * sub            # sublane-aligned row count
    pad = rows * LANES - n
    if pad:
        # Only hit when n isn't already (sub*128)-aligned (typical image shapes
        # are).  Zero-pad; the in-kernel tail mask drops the padded elements.
        x = jnp.pad(x, (0, pad))
        t = jnp.pad(t, (0, pad))
    x = x.reshape(rows, LANES)
    t = t.reshape(rows, LANES)

    tr = min(TR_MAX, rows)                  # rows % sub == 0, so tr % 8 == 0
    nblk = -(-rows // tr)                   # real row-blocks (last may be ragged)
    bpc = -(-nblk // NCORES)                # blocks per core
    total_blocks = NCORES * bpc             # includes fully-masked overflow blocks
    b_tail = n // (tr * LANES)              # first block index needing tail masking

    kernel = functools.partial(_dice_bce_kernel, bpc=bpc, tr=tr, n=n,
                               b_tail=b_tail, total_blocks=total_blocks)

    def in_map(c, i):
        # Clamp so overflow blocks (b >= nblk) re-read a valid block; their
        # contribution is masked to zero inside the kernel.
        return (jnp.minimum(c * bpc + i, nblk - 1), 0)

    in_spec = pl.BlockSpec((tr, LANES), in_map)
    part_spec = pl.BlockSpec((1, 8, LANES), lambda c, i: (c, 0, 0))
    part_shape = jax.ShapeDtypeStruct((NCORES, 8, LANES), jnp.float32)

    n_stream = rows * LANES
    cost = pl.CostEstimate(
        flops=20 * n_stream,
        transcendentals=3 * n_stream,
        bytes_accessed=n_stream * (x.dtype.itemsize + t.dtype.itemsize)
        + 3 * NCORES * 8 * LANES * 4,
    )

    oi, opt, ob = pl.pallas_call(
        kernel,
        out_shape=(part_shape, part_shape, part_shape),
        grid_spec=pltpu.PrefetchScalarGridSpec(
            num_scalar_prefetch=0,
            grid=(NCORES, bpc),
            in_specs=[in_spec, in_spec],
            out_specs=(part_spec, part_spec, part_spec),
        ),
        compiler_params=pltpu.CompilerParams(
            dimension_semantics=("parallel", "arbitrary")),
        cost_estimate=cost,
    )(x, t)

    intersection = jnp.sum(oi)
    sum_pt = jnp.sum(opt)
    bce_mean = jnp.sum(ob) / n
    dice_loss = 1.0 - (2.0 * intersection + smooth) / (sum_pt + smooth)
    return bce_mean + dice_loss


def _reference(inputs, targets, smooth=1.0):
    # Faithful to the PyTorch module: sigmoid, dice on flattened tensors,
    # BCE(mean) with torch's -100 clamp on the log terms.
    p = jax.nn.sigmoid(inputs.astype(jnp.float32)).reshape(-1)
    t = targets.astype(jnp.float32).reshape(-1)
    intersection = jnp.sum(p * t)
    dice_loss = 1.0 - (2.0 * intersection + smooth) / (jnp.sum(p) + jnp.sum(t) + smooth)
    bce = jnp.mean(-(t * jnp.maximum(jnp.log(p), -100.0)
                     + (1.0 - t) * jnp.maximum(jnp.log(1.0 - p), -100.0)))
    return bce + dice_loss


if __name__ == "__main__":
    key = jax.random.PRNGKey(0)
    k1, k2 = jax.random.split(key)
    # UNET retina segmentation: 1-channel logits and binary targets, NCHW
    logits = jax.random.normal(k1, (2, 1, 16, 16), dtype=jnp.float32)
    targets = (jax.random.uniform(k2, (2, 1, 16, 16)) > 0.5).astype(jnp.float32)

    loss = dice_bce_loss(logits, targets)
    jax.block_until_ready(loss)

    ref = _reference(logits, targets)
    assert jnp.allclose(loss, ref, rtol=5e-5, atol=5e-5), (loss, ref)
    print("KERNEL_OK")
</pallas_src>

<mosaic_0001>
module attributes {stable_mosaic.version = 11 : i64} {
  func.func @_dice_bce_kernel(%arg0: i32, %arg1: i32, %arg2: memref<8x128xf32, #tpu.memory_space<vmem>>, %arg3: memref<8x128xf32, #tpu.memory_space<vmem>>, %arg4: memref<1x8x128xf32, #tpu.memory_space<vmem>>, %arg5: memref<1x8x128xf32, #tpu.memory_space<vmem>>, %arg6: memref<1x8x128xf32, #tpu.memory_space<vmem>>) attributes {dimension_semantics = [#tpu.dimension_semantics<parallel>, #tpu.dimension_semantics<arbitrary>], iteration_bounds = array<i64: 2, 1>, scalar_prefetch = 0 : i64, scratch_operands = 0 : i64, tpu.core_type = #tpu.core_type<tc>, window_params = [{transform_indices = @transform_0, window_bounds = array<i64: 8, 128>}, {transform_indices = @transform_1, window_bounds = array<i64: 8, 128>}, {transform_indices = @transform_2, window_bounds = array<i64: 1, 8, 128>}, {transform_indices = @transform_3, window_bounds = array<i64: 1, 8, 128>}, {transform_indices = @transform_4, window_bounds = array<i64: 1, 8, 128>}]} {
    %c1_i32 = arith.constant 1 : i32
    %0 = arith.muli %arg0, %c1_i32 : i32
    %1 = arith.addi %0, %arg1 : i32
    %c0_i32 = arith.constant 0 : i32
    %2 = arith.cmpi eq, %arg1, %c0_i32 : i32
    %3 = arith.extui %2 : i1 to i32
    %c0_i32_0 = arith.constant 0 : i32
    %4 = arith.cmpi ne, %3, %c0_i32_0 : i32
    scf.if %4 {
      %cst_32 = arith.constant 0.000000e+00 : f32
      %66 = vector.broadcast %cst_32 : f32 to vector<1x8x128xf32>
      %c0_33 = arith.constant 0 : index
      %c0_34 = arith.constant 0 : index
      %c0_35 = arith.constant 0 : index
      %67 = vector.load %arg4[%c0_33, %c0_34, %c0_35] : memref<1x8x128xf32, #tpu.memory_space<vmem>>, vector<1x8x128xf32>
      tpu.vector_store %arg4[%c0_33, %c0_34, %c0_35], %66 {strides = array<i32>} : memref<1x8x128xf32, #tpu.memory_space<vmem>>, vector<1x8x128xf32>,
      %cst_36 = arith.constant 0.000000e+00 : f32
      %68 = vector.broadcast %cst_36 : f32 to vector<1x8x128xf32>
      %c0_37 = arith.constant 0 : index
      %c0_38 = arith.constant 0 : index
      %c0_39 = arith.constant 0 : index
      %69 = vector.load %arg5[%c0_37, %c0_38, %c0_39] : memref<1x8x128xf32, #tpu.memory_space<vmem>>, vector<1x8x128xf32>
      tpu.vector_store %arg5[%c0_37, %c0_38, %c0_39], %68 {strides = array<i32>} : memref<1x8x128xf32, #tpu.memory_space<vmem>>, vector<1x8x128xf32>,
      %cst_40 = arith.constant 0.000000e+00 : f32
      %70 = vector.broadcast %cst_40 : f32 to vector<1x8x128xf32>
      %c0_41 = arith.constant 0 : index
      %c0_42 = arith.constant 0 : index
      %c0_43 = arith.constant 0 : index
      %71 = vector.load %arg6[%c0_41, %c0_42, %c0_43] : memref<1x8x128xf32, #tpu.memory_space<vmem>>, vector<1x8x128xf32>
      tpu.vector_store %arg6[%c0_41, %c0_42, %c0_43], %70 {strides = array<i32>} : memref<1x8x128xf32, #tpu.memory_space<vmem>>, vector<1x8x128xf32>,
    } else {
    }
    %c0 = arith.constant 0 : index
    %c0_1 = arith.constant 0 : index
    %5 = vector.load %arg2[%c0, %c0_1] : memref<8x128xf32, #tpu.memory_space<vmem>>, vector<8x128xf32>
    %c0_2 = arith.constant 0 : index
    %c0_3 = arith.constant 0 : index
    %6 = vector.load %arg3[%c0_2, %c0_3] : memref<8x128xf32, #tpu.memory_space<vmem>>, vector<8x128xf32>
    %7 = math.absf %5 : vector<8x128xf32>
    %cst = arith.constant 0.000000e+00 : f32
    %8 = vector.broadcast %cst : f32 to vector<8x128xf32>
    %9 = arith.subf %8, %7 : vector<8x128xf32>
    %10 = math.exp %9 : vector<8x128xf32>
    %cst_4 = arith.constant 1.000000e+00 : f32
    %11 = vector.broadcast %cst_4 : f32 to vector<8x128xf32>
    %12 = arith.addf %11, %10 : vector<8x128xf32>
    %13 = math.log %12 : vector<8x128xf32>
    %14 = tpu.reciprocal %12 {approx = true} : vector<8x128xf32> -> vector<8x128xf32>
    %15 = arith.mulf %12, %14 : vector<8x128xf32>
    %cst_5 = arith.constant 2.000000e+00 : f32
    %16 = vector.broadcast %cst_5 : f32 to vector<8x128xf32>
    %17 = arith.subf %16, %15 : vector<8x128xf32>
    %18 = arith.mulf %14, %17 : vector<8x128xf32>
    %cst_6 = arith.constant 0.000000e+00 : f32
    %19 = vector.broadcast %cst_6 : f32 to vector<8x128xf32>
    %20 = arith.cmpf olt, %5, %19 : vector<8x128xf32>
    %21 = arith.mulf %10, %18 : vector<8x128xf32>
    %22 = arith.select %20, %21, %18 : vector<8x128xi1>, vector<8x128xf32>
    %cst_7 = arith.constant 0.000000e+00 : f32
    %23 = vector.broadcast %cst_7 : f32 to vector<8x128xf32>
    %24 = arith.maximumf %5, %23 : vector<8x128xf32>
    %25 = arith.addf %24, %13 : vector<8x128xf32>
    %26 = arith.mulf %6, %5 : vector<8x128xf32>
    %27 = arith.subf %25, %26 : vector<8x128xf32>
    %28 = arith.mulf %22, %6 : vector<8x128xf32>
    %29 = arith.addf %22, %6 : vector<8x128xf32>
    %30 = tpu.iota {dimensions = array<i32: 0>} : vector<8x128xi32>
    %c8_i32 = arith.constant 8 : i32
    %31 = arith.muli %1, %c8_i32 : i32
    %32 = vector.broadcast %31 : i32 to vector<8x128xi32>
    %33 = arith.addi %32, %30 : vector<8x128xi32>
    %c4_i32 = arith.constant 4 : i32
    %34 = vector.broadcast %c4_i32 : i32 to vector<8x128xi32>
    %35 = arith.cmpi slt, %33, %34 : vector<8x128xi32>
    %cst_8 = arith.constant 0.000000e+00 : f32
    %36 = vector.broadcast %cst_8 : f32 to vector<8x128xf32>
    %37 = arith.select %35, %28, %36 : vector<8x128xi1>, vector<8x128xf32>
    %cst_9 = arith.constant 0.000000e+00 : f32
    %38 = vector.broadcast %cst_9 : f32 to vector<8x128xf32>
    %39 = arith.select %35, %29, %38 : vector<8x128xi1>, vector<8x128xf32>
    %cst_10 = arith.constant 0.000000e+00 : f32
    %40 = vector.broadcast %cst_10 : f32 to vector<8x128xf32>
    %41 = arith.select %35, %27, %40 : vector<8x128xi1>, vector<8x128xf32>
    %c0_11 = arith.constant 0 : index
    %c0_12 = arith.constant 0 : index
    %c0_13 = arith.constant 0 : index
    %42 = vector.load %arg4[%c0_11, %c0_12, %c0_13] : memref<1x8x128xf32, #tpu.memory_space<vmem>>, vector<1x8x128xf32>
    %43 = vector.shape_cast %42 : vector<1x8x128xf32> to vector<8x128xf32>
    %44 = vector.shape_cast %37 : vector<8x128xf32> to vector<1x8x128xf32>
    %cst_14 = arith.constant dense<0.000000e+00> : vector<8x128xf32>
    %45 = vector.multi_reduction <add>, %44, %cst_14 [0] : vector<1x8x128xf32> to vector<8x128xf32>
    %46 = arith.addf %43, %45 : vector<8x128xf32>
    %c0_15 = arith.constant 0 : index
    %c0_16 = arith.constant 0 : index
    %c0_17 = arith.constant 0 : index
    %47 = vector.load %arg4[%c0_15, %c0_16, %c0_17] : memref<1x8x128xf32, #tpu.memory_space<vmem>>, vector<1x8x128xf32>
    %48 = vector.shape_cast %47 : vector<1x8x128xf32> to vector<8x128xf32>
    %49 = vector.shape_cast %46 : vector<8x128xf32> to vector<1x8x128xf32>
    tpu.vector_store %arg4[%c0_15, %c0_16, %c0_17], %49 {strides = array<i32>} : memref<1x8x128xf32, #tpu.memory_space<vmem>>, vector<1x8x128xf32>,
    %c0_18 = arith.constant 0 : index
    %c0_19 = arith.constant 0 : index
    %c0_20 = arith.constant 0 : index
    %50 = vector.load %arg5[%c0_18, %c0_19, %c0_20] : memref<1x8x128xf32, #tpu.memory_space<vmem>>, vector<1x8x128xf32>
    %51 = vector.shape_cast %50 : vector<1x8x128xf32> to vector<8x128xf32>
    %52 = vector.shape_cast %39 : vector<8x128xf32> to vector<1x8x128xf32>
    %cst_21 = arith.constant dense<0.000000e+00> : vector<8x128xf32>
    %53 = vector.multi_reduction <add>, %52, %cst_21 [0] : vector<1x8x128xf32> to vector<8x128xf32>
    %54 = arith.addf %51, %53 : vector<8x128xf32>
    %c0_22 = arith.constant 0 : index
    %c0_23 = arith.constant 0 : index
    %c0_24 = arith.constant 0 : index
    %55 = vector.load %arg5[%c0_22, %c0_23, %c0_24] : memref<1x8x128xf32, #tpu.memory_space<vmem>>, vector<1x8x128xf32>
    %56 = vector.shape_cast %55 : vector<1x8x128xf32> to vector<8x128xf32>
    %57 = vector.shape_cast %54 : vector<8x128xf32> to vector<1x8x128xf32>
    tpu.vector_store %arg5[%c0_22, %c0_23, %c0_24], %57 {strides = array<i32>} : memref<1x8x128xf32, #tpu.memory_space<vmem>>, vector<1x8x128xf32>,
    %c0_25 = arith.constant 0 : index
    %c0_26 = arith.constant 0 : index
    %c0_27 = arith.constant 0 : index
    %58 = vector.load %arg6[%c0_25, %c0_26, %c0_27] : memref<1x8x128xf32, #tpu.memory_space<vmem>>, vector<1x8x128xf32>
    %59 = vector.shape_cast %58 : vector<1x8x128xf32> to vector<8x128xf32>
    %60 = vector.shape_cast %41 : vector<8x128xf32> to vector<1x8x128xf32>
    %cst_28 = arith.constant dense<0.000000e+00> : vector<8x128xf32>
    %61 = vector.multi_reduction <add>, %60, %cst_28 [0] : vector<1x8x128xf32> to vector<8x128xf32>
    %62 = arith.addf %59, %61 : vector<8x128xf32>
    %c0_29 = arith.constant 0 : index
    %c0_30 = arith.constant 0 : index
    %c0_31 = arith.constant 0 : index
    %63 = vector.load %arg6[%c0_29, %c0_30, %c0_31] : memref<1x8x128xf32, #tpu.memory_space<vmem>>, vector<1x8x128xf32>
    %64 = vector.shape_cast %63 : vector<1x8x128xf32> to vector<8x128xf32>
    %65 = vector.shape_cast %62 : vector<8x128xf32> to vector<1x8x128xf32>
    tpu.vector_store %arg6[%c0_29, %c0_30, %c0_31], %65 {strides = array<i32>} : memref<1x8x128xf32, #tpu.memory_space<vmem>>, vector<1x8x128xf32>,
    return
  }
  func.func @transform_0(%arg0: i32, %arg1: i32) -> (i32, i32) {
    %c1_i32 = arith.constant 1 : i32
    %0 = arith.muli %arg0, %c1_i32 : i32
    %1 = arith.addi %0, %arg1 : i32
    %c0_i32 = arith.constant 0 : i32
    %2 = arith.minsi %1, %c0_i32 : i32
    %c0_i32_0 = arith.constant 0 : i32
    %c0_i32_1 = arith.constant 0 : i32
    return %2, %c0_i32_0 : i32, i32
  }
  func.func @transform_1(%arg0: i32, %arg1: i32) -> (i32, i32) {
    %c1_i32 = arith.constant 1 : i32
    %0 = arith.muli %arg0, %c1_i32 : i32
    %1 = arith.addi %0, %arg1 : i32
    %c0_i32 = arith.constant 0 : i32
    %2 = arith.minsi %1, %c0_i32 : i32
    %c0_i32_0 = arith.constant 0 : i32
    %c0_i32_1 = arith.constant 0 : i32
    return %2, %c0_i32_0 : i32, i32
  }
  func.func @transform_2(%arg0: i32, %arg1: i32) -> (i32, i32, i32) {
    %c0_i32 = arith.constant 0 : i32
    %c0_i32_0 = arith.constant 0 : i32
    %c0_i32_1 = arith.constant 0 : i32
    return %arg0, %c0_i32, %c0_i32_0 : i32, i32, i32
  }
  func.func @transform_3(%arg0: i32, %arg1: i32) -> (i32, i32, i32) {
    %c0_i32 = arith.constant 0 : i32
    %c0_i32_0 = arith.constant 0 : i32
    %c0_i32_1 = arith.constant 0 : i32
    return %arg0, %c0_i32, %c0_i32_0 : i32, i32, i32
  }
  func.func @transform_4(%arg0: i32, %arg1: i32) -> (i32, i32, i32) {
    %c0_i32 = arith.constant 0 : i32
    %c0_i32_0 = arith.constant 0 : i32
    %c0_i32_1 = arith.constant 0 : i32
    return %arg0, %c0_i32, %c0_i32_0 : i32, i32, i32
  }
}

</mosaic_0001>

<bundles_post_ra>
// kernel: tpu_custom_call.1
= control target key start
LH: loop header
LB: loop body
LE: loop exit
PB: predicated region body
PF: predicated region fallthrough
CT: control target
= control target key end

     0   :  { %s1235_s0 = inlined_call_operand.hbm [shape: f32[8,128], index: 0, kind: input, shape index: {}]   ;;  %s1236_s1 = inlined_call_operand.hbm [shape: f32[8,128], index: 1, kind: input, shape index: {}]   ;;  %s1237_s2 = inlined_call_operand.hbm [shape: f32[2,8,128], index: 2, kind: output, shape index: {0}]   ;;  %s1238_s3 = inlined_call_operand.hbm [shape: f32[2,8,128], index: 3, kind: output, shape index: {1}]   ;;  %s1239_s4 = inlined_call_operand.hbm [shape: f32[2,8,128], index: 4, kind: output, shape index: {2}]  }
   0x1   :  { %1244 = sst [smem:[#allocation15_spill]] %s1235_s0 }
   0x2   :  { %10 = vsyncpa [#allocation3], 0 }
   0x3   :  { %12 = vsyncpa [#allocation3 + $0x1], 0 }
   0x4   :  { %13 = vsyncpa [#allocation6], 0 }
   0x5   :  { %15 = vsyncpa [#allocation6 + $0x1], 0 }
   0x6   :  { %16 = vsyncpa [#allocation4], 0 }
   0x7   :  { %18 = vsyncpa [#allocation4 + $0x1], 0 }
   0x8   :  { %19 = vsyncpa [#allocation9], 0 }
   0x9   :  { %21 = vsyncpa [#allocation9 + $0x1], 0  ;;  %s957_s15 = smov 0   ;;  %s959_s16 = smov 0  }
   0xa   :  { %s961_s17 = smov 0   ;;  %s963_s18 = smov 0  }
   0xb   :  { %s965_s19 = smov 0   ;;  %s967_s20 = smov 0  }
   0xc   :  { %s969_s21 = smov 0   ;;  %s971_s22 = smov 0  }
   0xd LB: > { %s996_s23 = sadd.s32 4294967295, %s925_s22   ;;  %s1242_s24 = sadd.s32 4294967294, %s925_s22   ;;  %s925_s22 = sphi %s971_s22, %s27_s22   ;;  %s921_s21 = sphi %s969_s21, %s1266_s21   ;;  %s917_s20 = sphi %s967_s20, %s1265_s20   ;;  %s913_s19 = sphi %s965_s19, %s1225_s19   ;;  %s909_s18 = sphi %s963_s18, %s1264_s18   ;;  %s905_s17 = sphi %s961_s17, %s1263_s17   ;;  %s901_s16 = sphi %s959_s16, %s1262_s16   ;;  %s897_s15 = sphi %s957_s15, %s1261_s15  }
   0xe   : > { %s39_s25 = sadd.s32 1, %s921_s21  ;;  %p894_p1 = scmp.ne.s32.totalorder %s913_s19, 0 }
   0xf   : > { %p41_p0 = scmp.ge.s32.totalorder %s39_s25, 2  ;;  %p60_p2 = scmp.eq.s32.totalorder %s925_s22, 0 }
  0x10   : > { %p65_p3 = scmp.ne.s32.totalorder %s913_s19, %s909_s18  ;;  %p66_p5 = scmp.eq.s32.totalorder %s996_s23, 0 }
  0x11   : > { %s1268_s25 = smov (%p41_p0, %s39_s25), 0  ;;  %p1005_p4 = por %p894_p1, %p60_p2 }
  0x12   : > { %p1010_p6 = por %p66_p5, %p65_p3  ;;  %s107_s28 = ssub.s32 %s921_s21, %s1268_s25 }
  0x13   : > { %p108_p7 = scmp.eq.s32.totalorder %s107_s28, 0  ;;  %s110_s29 = sadd.s32 1, %s905_s17 }
  0x14   : > { %s1246_s27 = scalar_select %p1010_p6, 1, 0 }
  0x15   : > { %s1018_s30 = scalar_select %p108_p7, %s905_s17, %s110_s29  }
  0x16   : > { %p120_p8 = scmp.ne.s32.totalorder %s905_s17, %s901_s16  ;;  %p121_p9 = scmp.eq.s32.totalorder %s996_s23, 1 }
  0x17   : > { %p126_p10 = scmp.ne.s32.totalorder %s901_s16, %s897_s15  ;;  %p127_p11 = scmp.eq.s32.totalorder %s1242_s24, 1 }
  0x18   : > { %p1027_p12 = por %p121_p9, %p120_p8  ;;  %p617_p1 = scmp.lt.s32.totalorder %s925_s22, 2 }
  0x19   : > { %p1032_p0 = por %p127_p11, %p126_p10  ;;  %s927_s7 = smov [#allocation2]  }
  0x1a   : > { %s1247_s5 = scalar_select %p1027_p12, 1, 0 }
  0x1b   : > { %s1248_s6 = scalar_select %p1032_p0, 1, 0 }
  0x1c   : > { %s213_s8 = sshll.u32 %s927_s7, 4  ;;  %p1039_p2 = pnand %p617_p1, %p1005_p4  ;;  %s214_s8 = int_to_ptr.vmem [resolvable:$true] %s213_s8 }
  0x1d   : > { %s1250_s0 = sld [smem:[#allocation15_spill]] }
  0x1e   : > { %p700_p8 = pneg %p1039_p2 }
  0x23   : > { %s698_s12 = scalar_lea.hbm %s1250_s0, 128 }
  0x24   : > { %p699_p7 = scmp.ne.s32.totalorder %s1250_s0, %s698_s12  ;;  %p705_p10 = scmp.lt.u32.totalorder %s698_s12, %s698_s12 }
  0x25   : > { %p707_p11 = scmp.lt.u32.totalorder %s698_s12, %s1250_s0 }
  0x26   : > { %p701_p4 = pnand %p700_p8, %p699_p7 }
  0x27   : > { %p708_p1 = por %p707_p11, %p705_p10 }
  0x28   : > { %p702_p9 = pneg %p701_p4 }
  0x2a   : > { %p709_p13 = pnand %p708_p1, %p702_p9 }
  0x2c   : > { %712 = shalt.err (!%p709_p13)
}
  0x2d   : > { %s713_s28 = scalar_lea.vmem %s214_s8, 128  ;;  %s720_s29 = scalar_lea.vmem %s214_s8, 256 }
  0x2e   : > { %p714_p3 = scmp.ne.s32.totalorder %s214_s8, %s713_s28  ;;  %p721_p12 = scmp.lt.s32.totalorder %s214_s8, %s214_s8 }
  0x2f   : > { %p722_p6 = scmp.lt.s32.totalorder %s720_s29, %s713_s28 }
  0x30   : > { %p716_p5 = pnand %p714_p3, %p700_p8 }
  0x31   : > { %p723_p7 = por %p722_p6, %p721_p12 }
  0x32   : > { %p717_p0 = pneg %p716_p5 }
  0x34   : > { %p724_p4 = pnand %p723_p7, %p717_p0 }
  0x36   : > { %727 = shalt.err (!%p724_p4)
}
  0x37   : > { %603 = dma.hbm_to_vmem [thread:$0]  (!%p1039_p2), %s1250_s0, 128, %s214_s8, [#allocation3]  }
  0x38   : > { %p1251_p13 = scmp.lt.s32.totalorder %s925_s22, 3  ;;  %p1252_p9 = scmp.ge.s32.totalorder %s925_s22, 1 }
  0x39   : > { %s928_s12 = smov [#allocation5]   ;;  %s728_s26 = scalar_lea.hbm %s1236_s1, 128 }
  0x3a   : > { %p1071_p10 = pnand %p1252_p9, %p1251_p13  ;;  %s234_s13 = sshll.u32 %s928_s12, 4  ;;  %s235_s13 = int_to_ptr.vmem [resolvable:$true] %s234_s13 }
  0x3b   : > { %p729_p6 = scmp.ne.s32.totalorder %s1236_s1, %s728_s26  ;;  %p735_p3 = scmp.lt.u32.totalorder %s728_s26, %s728_s26 }
  0x3c   : > { %s1253_s11 = scalar_select %p1071_p10, 1, 0 }
  0x3d   : > { %p731_p12 = pnand %p729_p6, %p700_p8  ;;  %p737_p5 = scmp.lt.u32.totalorder %s728_s26, %s1236_s1 }
  0x3f   : > { %p732_p0 = pneg %p731_p12  ;;  %p738_p11 = por %p737_p5, %p735_p3 }
  0x41   : > { %p739_p1 = pnand %p738_p11, %p732_p0 }
  0x43   : > { %742 = shalt.err (!%p739_p1)
}
  0x44   : > { %s743_s10 = scalar_lea.vmem %s235_s13, 128  ;;  %s750_s12 = scalar_lea.vmem %s235_s13, 256 }
  0x45   : > { %p744_p7 = scmp.ne.s32.totalorder %s235_s13, %s743_s10  ;;  %p751_p9 = scmp.lt.s32.totalorder %s235_s13, %s235_s13 }
  0x46   : > { %p752_p10 = scmp.lt.s32.totalorder %s750_s12, %s743_s10 }
  0x47   : > { %p746_p4 = pnand %p744_p7, %p700_p8 }
  0x48   : > { %p753_p6 = por %p752_p10, %p751_p9 }
  0x49   : > { %p747_p13 = pneg %p746_p4 }
  0x4b   : > { %p754_p12 = pnand %p753_p6, %p747_p13 }
  0x4d   : > { %757 = shalt.err (!%p754_p12)
}
  0x4e   : > { %606 = dma.hbm_to_vmem [thread:$0]  (!%p1039_p2), %s1236_s1, 128, %s235_s13, [#allocation6]  }
  0x4f   : > { %p1254_p0 = scmp.ne.s32.totalorder %s1253_s11, 0 }
  0x50   : > { %s245_s26 = sand.u32 (!%p1254_p0), 1, %s913_s19   ;;  %p1255_p8 = scmp.ne.s32.totalorder (!%p1254_p0), %s1246_s27, 0 }
  0x51   : > { %243 = sbr.rel (%p1254_p0) target bundleno = 194 (0xc2), region = 28  ;;  %s576_s28 = sshll.u32 (!%p1254_p0), %s245_s26, 3 }
  0x52   : > { %s246_s29 = scalar_lea.sflag (!%p1254_p0), [#allocation3], %s245_s26  ;;  %s249_s8 = scalar_lea.vmem (!%p1254_p0), [#allocation2], %s576_s28 }
  0x58   : > { %879 = dma.done.wait (%p1255_p8), %s246_s29, 128  }
  0x59   : > { %881 = vsyncadd (%p1255_p8), %s246_s29, 4294967168  ;;  %s255_s9 = scalar_lea.sflag [#allocation6], %s245_s26  ;;  %s258_s7 = scalar_lea.vmem [#allocation5], %s576_s28 }
  0x5a   : > { %883 = dma.done.wait (%p1255_p8), %s255_s9, 128  }
  0x5b   : > { %885 = vsyncadd (%p1255_p8), %s255_s9, 4294967168  ;;  %v312_v0 = vld [vmem:[%s249_s8] sm:$0xff]  ;;  %v334_v6 = vlaneseq  ;;  %s581_s11 = sshll.u32 %s917_s20, 3  ;;  %v313_v9 = vld [vmem:[%s258_s7] sm:$0xff]  ;;  %s1243_s27 = sand.u32 1, %s901_s16  }
  0x5c   : > { %v314_v1 = vand.u32 2147483647, %v312_v0  ;;  %v337_v8 = vstv %s581_s11  ;;  %v328_v11 = vmax.f32 %v312_v0, 0.0  ;;  %v330_v16 = vmul.f32 %v313_v9, %v312_v0  ;;  %s578_s13 = sshll.u32 %s1243_s27, 3  ;;  %s360_s10 = sand.u32 1, %s996_s23  }
  0x5d   : > { %v335_v7 = vshrl.u32 %v334_v6, 7  ;;  %vm325_vm1 = vcmp.lt.f32.partialorder %v312_v0, 0.0  ;;  %s585_s12 = sshll.u32 %s917_s20, 7  ;;  %s290_s14 = scalar_lea.vmem [#allocation8], %s578_s13 }
  0x5e   : > { %v315_v2 = vsub.f32 0.0, %v314_v1  ;;  %s392_s18 = sshll.u32 %s290_s14, 4  ;;  %s297_s26 = scalar_lea.vmem [#allocation10], %s578_s13  ;;  %s1120_s18 = int_to_ptr.vmem [resolvable:$true] %s392_s18 }
  0x5f   : > { %v338_v14 = vadd.s32 %v337_v8, %v335_v7  ;;  %s283_s28 = scalar_lea.vmem [#allocation7], %s578_s13  ;;  %s405_s8 = sshll.u32 %s297_s26, 4  ;;  %s1129_s8 = int_to_ptr.vmem [resolvable:$true] %s405_s8 }
  0x60   : > { %v316_v3 = vmul.f32 1.442695, %v315_v2  ;;  %s379_s29 = sshll.u32 %s283_s28, 4  ;;  %s1118_s7 = scalar_lea.hbm %s1238_s3, %s585_s12  ;;  %s1127_s29 = int_to_ptr.vmem [resolvable:$true] %s379_s29 }
  0x61   : > { %vm339_vm0 = vcmp.lt.s32.totalorder %v338_v14, 4  ;;  %s1125_s13 = scalar_lea.hbm %s1237_s2, %s585_s12  ;;  %s1134_s23 = scalar_lea.hbm %s1239_s4, %s585_s12 }
  0x62   : > { %692 = vpow2.f32 %v316_v3  ;;  %s1136_s24 = scalar_lea.sflag [#allocation9], %s360_s10  ;;  %s758_s27 = scalar_lea.vmem %s1120_s18, 128 }
  0x63   : > { %p759_p2 = scmp.ne.s32.totalorder %s1120_s18, %s758_s27  ;;  %p1256_p10 = scmp.ne.s32.totalorder %s1247_s5, 0 }
  0x64   : > { %s929_s20 = smov [#allocation8]  }
  0x65   : > { %p760_p3 = pnand %p759_p2, %p1256_p10  ;;  %s762_s11 = sshll.u32 %s929_s20, 4  ;;  %s763_s11 = int_to_ptr.vmem [resolvable:$false] %s762_s11 }
  0x66   : > { %s764_s0 = scalar_lea.vmem %s763_s11, 256  ;;  %p765_p11 = scmp.lt.s32.totalorder %s1120_s18, %s763_s11 }
  0x67   : > { %p761_p5 = pneg %p760_p3  ;;  %p766_p1 = scmp.lt.s32.totalorder %s764_s0, %s758_s27 }
  0x69   : > { %p767_p7 = por %p766_p1, %p765_p11 }
  0x6b   : > { %p768_p4 = pnand %p767_p7, %p761_p5 }
  0x6c   : > { %v693_v4 = vpop.eup %692 }
  0x6d   : > { %v318_v5 = vadd.f32 1.0, %v693_v4 }
  0x6f   : > { %694 = vrcp.f32 %v318_v5 }
  0x70   : > { %696 = vlog2.f32 %v318_v5 }
  0x79   : > { %v695_v10 = vpop.eup %694 }
  0x7a   : > { %v697_v12 = vpop.eup %696  ;;  %v322_v13 = vmul.f32 %v695_v10, %v318_v5 }
  0x7b   : > { %v320_v15 = vmul.f32 0.6931472, %v697_v12 }
  0x7c   : > { %v323_v17 = vsub.f32 2.0, %v322_v13 }
  0x7d   : > { %v329_v18 = vadd.f32 %v328_v11, %v320_v15 }
  0x7e   : > { %v324_v19 = vmul.f32 %v695_v10, %v323_v17 }
  0x7f   : > { %v331_v20 = vsub.f32 %v329_v18, %v330_v16 }
  0x80   : > { %v326_v21 = vmul.f32 %v693_v4, %v324_v19 }
  0x81   : > { %v342_v22 = vsel %vm339_vm0, %v331_v20, 0.0 }
  0x82   : > { %v327_v23 = vsel %vm325_vm1, %v326_v21, %v324_v19  ;;  %354 = vst [vmem:[%s297_s26] sm:$0xff] %v342_v22 }
  0x83   : > { %v333_v24 = vadd.f32 %v327_v23, %v313_v9  ;;  %v332_v25 = vmul.f32 %v327_v23, %v313_v9 }
  0x85   : > { %v341_v26 = vsel %vm339_vm0, %v333_v24, 0.0  ;;  %v340_v27 = vsel %vm339_vm0, %v332_v25, 0.0 }
  0x86   : > { %350 = vst [vmem:[%s290_s14] sm:$0xff] %v341_v26  ;;  %346 = vst [vmem:[%s283_s28] sm:$0xff] %v340_v27 }
  0x87   : > { %771 = shalt.err (!%p768_p4)
}
  0x88   : > { %s772_s10 = scalar_lea.hbm %s1118_s7, 128  ;;  %s776_s28 = scalar_lea.hbm %s1238_s3, 256 }
  0x89   : > { %p773_p13 = scmp.ne.s32.totalorder %s1118_s7, %s772_s10  ;;  %p777_p12 = scmp.lt.u32.totalorder %s1118_s7, %s1238_s3 }
  0x8a   : > { %p778_p0 = scmp.lt.u32.totalorder %s776_s28, %s772_s10  ;;  %p780_p2 = scmp.lt.u32.totalorder %s772_s10, %s1118_s7 }
  0x8b   : > { %p774_p9 = pnand %p773_p13, %p1256_p10 }
  0x8c   : > { %p779_p8 = por %p778_p0, %p777_p12 }
  0x8d   : > { %p775_p6 = pneg %p774_p9 }
  0x8e   : > { %p781_p3 = por %p780_p2, %p779_p8 }
  0x90   : > { %p782_p5 = pnand %p781_p3, %p775_p6 }
  0x92   : > { %785 = shalt.err (!%p782_p5)
}
  0x93   : > { %595 = dma.vmem_to_hbm [thread:$0]  (%p1256_p10), %s1120_s18, 128, %s1118_s7, %s1136_s24  }
  0x94   : > { %s1257_s0 = sand.u32 1, %s901_s16   ;;  %s786_s20 = scalar_lea.vmem %s1127_s29, 128 }
  0x95   : > { %s356_s27 = scalar_lea.sflag [#allocation4], %s1257_s0  ;;  %p787_p11 = scmp.ne.s32.totalorder %s1127_s29, %s786_s20 }
  0x96   : > { %s930_s11 = smov [#allocation7]  }
  0x97   : > { %p788_p1 = pnand %p787_p11, %p1256_p10  ;;  %s790_s10 = sshll.u32 %s930_s11, 4  ;;  %s791_s10 = int_to_ptr.vmem [resolvable:$false] %s790_s10 }
  0x98   : > { %s792_s12 = scalar_lea.vmem %s791_s10, 256  ;;  %p793_p4 = scmp.lt.s32.totalorder %s1127_s29, %s791_s10 }
  0x99   : > { %p789_p7 = pneg %p788_p1  ;;  %p794_p13 = scmp.lt.s32.totalorder %s792_s12, %s786_s20 }
  0x9b   : > { %p795_p9 = por %p794_p13, %p793_p4 }
  0x9d   : > { %p796_p6 = pnand %p795_p9, %p789_p7 }
  0x9f   : > { %799 = shalt.err (!%p796_p6)
}
  0xa0   : > { %s800_s18 = scalar_lea.hbm %s1125_s13, 128  ;;  %s804_s28 = scalar_lea.hbm %s1237_s2, 256 }
  0xa1   : > { %p801_p12 = scmp.ne.s32.totalorder %s1125_s13, %s800_s18  ;;  %p805_p2 = scmp.lt.u32.totalorder %s1125_s13, %s1237_s2 }
  0xa2   : > { %p806_p3 = scmp.lt.u32.totalorder %s804_s28, %s800_s18  ;;  %p808_p11 = scmp.lt.u32.totalorder %s800_s18, %s1125_s13 }
  0xa3   : > { %p802_p0 = pnand %p801_p12, %p1256_p10 }
  0xa4   : > { %p807_p5 = por %p806_p3, %p805_p2 }
  0xa5   : > { %p803_p8 = pneg %p802_p0 }
  0xa6   : > { %p809_p1 = por %p808_p11, %p807_p5 }
  0xa8   : > { %p810_p7 = pnand %p809_p1, %p803_p8 }
  0xaa   : > { %813 = shalt.err (!%p810_p7)
}
  0xab   : > { %594 = dma.vmem_to_hbm [thread:$0]  (%p1256_p10), %s1127_s29, 128, %s1125_s13, %s356_s27  }
  0xac   : > { %s814_s0 = scalar_lea.vmem %s1129_s8, 128  ;;  %s931_s20 = smov [#allocation10]  }
  0xad   : > { %p815_p4 = scmp.ne.s32.totalorder %s1129_s8, %s814_s0  ;;  %s818_s11 = sshll.u32 %s931_s20, 4  ;;  %s819_s11 = int_to_ptr.vmem [resolvable:$false] %s818_s11 }
  0xae   : > { %s820_s10 = scalar_lea.vmem %s819_s11, 256  ;;  %p821_p6 = scmp.lt.s32.totalorder %s1129_s8, %s819_s11 }
  0xaf   : > { %p816_p13 = pnand %p815_p4, %p1256_p10  ;;  %p822_p12 = scmp.lt.s32.totalorder %s820_s10, %s814_s0 }
  0xb1   : > { %p817_p9 = pneg %p816_p13  ;;  %p823_p0 = por %p822_p12, %p821_p6 }
  0xb3   : > { %p824_p8 = pnand %p823_p0, %p817_p9 }
  0xb5   : > { %827 = shalt.err (!%p824_p8)
}
  0xb6   : > { %s828_s29 = scalar_lea.hbm %s1134_s23, 128  ;;  %s832_s12 = scalar_lea.hbm %s1239_s4, 256 }
  0xb7   : > { %p829_p2 = scmp.ne.s32.totalorder %s1134_s23, %s828_s29  ;;  %p833_p11 = scmp.lt.u32.totalorder %s1134_s23, %s1239_s4 }
  0xb8   : > { %p834_p1 = scmp.lt.u32.totalorder %s832_s12, %s828_s29  ;;  %p836_p4 = scmp.lt.u32.totalorder %s828_s29, %s1134_s23 }
  0xb9   : > { %p830_p3 = pnand %p829_p2, %p1256_p10 }
  0xba   : > { %p835_p7 = por %p834_p1, %p833_p11 }
  0xbb   : > { %p831_p5 = pneg %p830_p3 }
  0xbc   : > { %p837_p13 = por %p836_p4, %p835_p7 }
  0xbe   : > { %p838_p9 = pnand %p837_p13, %p831_p5 }
  0xc0   : > { %841 = shalt.err (!%p838_p9)
}
  0xc1   : > { %596 = dma.vmem_to_hbm [thread:$0]  (%p1256_p10), %s1129_s8, 128, %s1134_s23, %s1136_s24  }
  0xc2 PF: > { %s417_s14 = sand.u32 1, %s897_s15   ;;  %p1258_p6 = scmp.ne.s32.totalorder %s1248_s6, 0 }
  0xc3   : > { %p1259_p12 = scmp.ge.s32.totalorder %s925_s22, 2  ;;  %s418_s28 = scalar_lea.sflag [#allocation4], %s417_s14 }
  0xc5   : > { %p608_p0 = pnand %p1259_p12, %p1258_p6 }
  0xc7   : > { %887 = dma.done.wait (!%p608_p0), %s418_s28, 128  }
  0xc8   : > { %889 = vsyncadd (!%p608_p0), %s418_s28, 4294967168  ;;  %s1260_s26 = sadd.s32 4294967294, %s925_s22  }
  0xc9   : > { %s426_s9 = sand.u32 1, %s1260_s26  }
  0xca   : > { %s427_s0 = scalar_lea.sflag [#allocation9], %s426_s9 }
  0xcb   : > { %891 = dma.done.wait (!%p608_p0), %s427_s0, 256  }
  0xcc   : > { %893 = vsyncadd (!%p608_p0), %s427_s0, 4294967040  ;;  %s27_s22 = sadd.s32 1, %s925_s22   ;;  %s1261_s15 = smov %s901_s16 }
  0xcd   : > { %p24_p10 = scmp.ge.s32.totalorder %s27_s22, 4   ;;  %s1262_s16 = smov %s905_s17 }
  0xce   : > { %s1263_s17 = smov %s1018_s30  ;;  %s1264_s18 = smov %s913_s19 }
  0xcf   : > { %s1225_s19 = smov 0   ;;  %s1265_s20 = smov %s921_s21 }
  0xd0   : > { %s1266_s21 = smov %s1268_s25  ;;  %26 = sbr.rel (!%p24_p10) target bundleno = 13 (0xd), region = 122 }
  0xd7   :  { %441 = vsyncpa [#allocation3], 1 }
  0xd8   :  { %443 = vsyncpa [#allocation3 + $0x1], 1 }
  0xd9   :  { %444 = vsyncpa [#allocation6], 1 }
  0xda   :  { %446 = vsyncpa [#allocation6 + $0x1], 1 }
  0xdb   :  { %447 = vsyncpa [#allocation4], 1 }
  0xdc   :  { %449 = vsyncpa [#allocation4 + $0x1], 1 }
  0xdd   :  { %450 = vsyncpa [#allocation9], 1 }
  0xde   :  { %452 = vsyncpa [#allocation9 + $0x1], 1 }

</bundles_post_ra>
